<compile_context>
chip_gen: v5e
topology: v5e:2x2
jax: 0.10.0
libtpu: 0.0.40
codegen_flags: <defaults>
</compile_context>

<pallas_src>
import jax
import jax.numpy as jnp
from jax.experimental import pallas as pl
from jax.experimental.pallas import tpu as pltpu


def _round_up(x, m):
    return ((x + m - 1) // m) * m


def _make_kernel(TB, S, E, K, F, C_pad, KE, KE_pad, FCp):
    L = S - K + 1  # 'valid' conv output length

    def kernel(x_ref, w_ref, b_ref, o_ref, lhs_ref):
        # x_ref:   (TB, S, E)        bf16 embedded activations for TB batch rows
        # w_ref:   (KE_pad, F*C_pad) bf16 packed conv weights (resident in VMEM)
        # b_ref:   (1, F*C_pad)      f32 bias
        # o_ref:   (TB, C_pad)       f32 per-concept global max (lane-dense)
        # lhs_ref: (TB, L, KE_pad)   f32 VMEM scratch for the unfolded LHS

        # Unfold (im2col) in VMEM: lhs[t, l, k*E + e] = x[t, l+k, e].
        # Done in f32 (robust sublane-offset slicing / narrow lane stores);
        # the matmul operands themselves are cast to bf16.
        x = x_ref[...].astype(jnp.float32)                       # (TB, S, E)
        if KE_pad > KE:                                          # zero contraction pad
            lhs_ref[:, :, KE:] = jnp.zeros((TB, L, KE_pad - KE), jnp.float32)
        for k in range(K):
            lhs_ref[:, :, k * E:(k + 1) * E] = x[:, k:k + L, :]

        lhs = lhs_ref[...].reshape(TB * L, KE_pad).astype(jnp.bfloat16)

        # One MXU pass: (TB*L, KE_pad) @ (KE_pad, F*C_pad), f32 accumulate.
        acc = jnp.dot(lhs, w_ref[...], preferred_element_type=jnp.float32)

        # Position max first; bias + ReLU commute past it (per-column bias,
        # monotone activation), saving (L-1)*F*C_pad adds/relus per tile.
        mx = jnp.max(acc.reshape(TB, L, FCp), axis=1)            # (TB, F*C_pad)
        mx = jnp.maximum(mx + b_ref[...], 0.0)

        # Per-concept max over F filters: columns are F lane-aligned blocks of
        # C_pad (=128k) lanes, so this is a plain VPU max across vregs.
        out = mx[:, 0:C_pad]
        for f in range(1, F):
            out = jnp.maximum(out, mx[:, f * C_pad:(f + 1) * C_pad])
        o_ref[...] = out                                         # unmasked lane-dense store

    return kernel


def concept_extractor_multiple_cnn(input_ids, emb_table, conv_w, conv_b):
    """Forward of ConceptExtractorMultipleCNN.

    input_ids: (B, S) int32
    emb_table: (V, E) f32  -- row 0 must be zero (padding_idx=0 semantics)
    conv_w:    (C, F, E, K) f32 stacked per-concept Conv1d weights
    conv_b:    (C, F) f32
    returns:   (B, C) f32
    """
    B, S = input_ids.shape
    C, F, E, K = conv_w.shape
    L = S - K + 1
    assert L >= 1, "sequence shorter than filter size"

    KE = K * E
    KE_pad = _round_up(KE, 128)       # pack the contraction into full MXU passes
    C_pad = _round_up(C, 128)         # lane-dense per-concept columns
    FCp = F * C_pad

    # Batch tile: fill the MXU M dim (TB*L rows) and amortize grid-step
    # overhead; tiny B runs as a single program, large B keeps >=2 grid steps
    # so v7x's two TensorCores both get work.
    TB = B if B <= 16 else 16
    n_tiles = pl.cdiv(B, TB)
    B_pad = n_tiles * TB

    # Embedding lookup (gather) stays in XLA.
    # TODO(synk): for small V*E, fuse the gather in-kernel (emb_table resident
    # in VMEM + input_ids via scalar prefetch) to drop the extra HBM round-trip.
    x = jnp.take(emb_table, input_ids, axis=0).astype(jnp.bfloat16)   # (B, S, E)
    if B_pad != B:
        x = jnp.pad(x, ((0, B_pad - B), (0, 0), (0, 0)))

    # conv_w[c, f, e, k] -> w2[k*E + e, f*C_pad + c]; zero-pad contraction rows
    # and concept columns so every block is a clean multiple of 128 lanes.
    w2 = jnp.transpose(conv_w, (3, 2, 1, 0)).reshape(KE, F, C)
    w2 = jnp.pad(w2, ((0, KE_pad - KE), (0, 0), (0, C_pad - C)))
    w2 = w2.reshape(KE_pad, FCp).astype(jnp.bfloat16)
    # conv_b[c, f] -> b2[0, f*C_pad + c]
    b2 = jnp.pad(conv_b.T, ((0, 0), (0, C_pad - C))).reshape(1, FCp)
    b2 = b2.astype(jnp.float32)

    kernel = _make_kernel(TB, S, E, K, F, C_pad, KE, KE_pad, FCp)

    out = pl.pallas_call(
        kernel,
        out_shape=jax.ShapeDtypeStruct((B_pad, C_pad), jnp.float32),
        grid_spec=pltpu.PrefetchScalarGridSpec(
            num_scalar_prefetch=0,
            grid=(n_tiles,),
            in_specs=[
                # activations: one (TB, S, E) tile per grid step
                pl.BlockSpec((TB, S, E), lambda b: (b, 0, 0)),
                # weights / bias: full-extent, constant index_map -> DMA'd once
                # and resident in VMEM across the whole grid.
                # TODO(synk): pipeline_mode=pl.Buffered(1) would single-buffer
                # these constant blocks on VMEM-tight (v7x) production shapes.
                pl.BlockSpec((KE_pad, FCp), lambda b: (0, 0)),
                pl.BlockSpec((1, FCp), lambda b: (0, 0)),
            ],
            out_specs=pl.BlockSpec((TB, C_pad), lambda b: (b, 0)),
            scratch_shapes=[pltpu.VMEM((TB, L, KE_pad), jnp.float32)],
        ),
        compiler_params=pltpu.CompilerParams(
            dimension_semantics=("parallel",)),
    )(x, w2, b2)

    return out[:B, :C]


def _reference(input_ids, emb_table, conv_w, conv_b):
    # Pure-JAX mirror of the PyTorch forward for validation.
    B, S = input_ids.shape
    C, F, E, K = conv_w.shape
    L = S - K + 1
    x = jnp.take(emb_table, input_ids, axis=0)                      # (B, S, E)
    xu = jnp.stack([x[:, k:k + L, :] for k in range(K)], axis=3)    # (B, L, E, K)
    logits = jnp.einsum('blek,cfek->bcfl', xu, conv_w) \
        + conv_b[None, :, :, None]                                  # (B, C, F, L)
    feats = jnp.maximum(logits, 0.0)
    return jnp.max(feats, axis=(2, 3))                              # (B, C)


if __name__ == "__main__":
    # Small shapes consistent with the module's forward.
    VOCAB = 50
    EMBED_DIM = 16      # embed_dim
    N_FILTERS = 8       # n_filters (per TextualCNN)
    FILTER_SIZE = 5     # filter_size
    OUT_FEATURES = 12   # number of TextualCNN heads (out_features)
    B, S = 2, 12        # batch, sequence length

    key = jax.random.PRNGKey(0)
    k_ids, k_emb, k_w, k_b = jax.random.split(key, 4)

    input_ids = jax.random.randint(k_ids, (B, S), 0, VOCAB, dtype=jnp.int32)

    emb_table = 0.1 * jax.random.normal(k_emb, (VOCAB, EMBED_DIM), jnp.float32)
    emb_table = emb_table.at[0].set(0.0)  # padding_idx=0

    fan_in = EMBED_DIM * FILTER_SIZE
    conv_w = jax.random.normal(
        k_w, (OUT_FEATURES, N_FILTERS, EMBED_DIM, FILTER_SIZE),
        jnp.float32) / jnp.sqrt(fan_in)
    conv_b = 0.01 * jax.random.normal(
        k_b, (OUT_FEATURES, N_FILTERS), jnp.float32)

    out = concept_extractor_multiple_cnn(input_ids, emb_table, conv_w, conv_b)
    out = jax.block_until_ready(out)

    ref = jax.block_until_ready(_reference(input_ids, emb_table, conv_w, conv_b))
    assert out.shape == (B, OUT_FEATURES), out.shape
    assert jnp.allclose(out, ref, rtol=1e-2, atol=1e-2), (out, ref)

    print("KERNEL_OK")
</pallas_src>

<mosaic_0001>
module attributes {stable_mosaic.version = 11 : i64} {
  func.func @kernel(%arg0: i32, %arg1: memref<2x12x16xbf16, #tpu.memory_space<vmem>>, %arg2: memref<128x1024xbf16, #tpu.memory_space<vmem>>, %arg3: memref<1x1024xf32, #tpu.memory_space<vmem>>, %arg4: memref<2x128xf32, #tpu.memory_space<vmem>>, %arg5: memref<2x8x128xf32, #tpu.memory_space<vmem>>) attributes {dimension_semantics = [#tpu.dimension_semantics<parallel>], iteration_bounds = array<i64: 1>, scalar_prefetch = 0 : i64, scratch_operands = 1 : i64, tpu.core_type = #tpu.core_type<tc>, window_params = [{transform_indices = @transform_0, window_bounds = array<i64: 2, 12, 16>}, {pipeline_mode = #tpu.pipeline_mode<synchronous>, transform_indices = @transform_1, window_bounds = array<i64: 128, 1024>}, {pipeline_mode = #tpu.pipeline_mode<synchronous>, transform_indices = @transform_2, window_bounds = array<i64: 1, 1024>}, {transform_indices = @transform_3, window_bounds = array<i64: 2, 128>}]} {
    %c0 = arith.constant 0 : index
    %c0_0 = arith.constant 0 : index
    %c0_1 = arith.constant 0 : index
    %0 = vector.load %arg1[%c0, %c0_0, %c0_1] : memref<2x12x16xbf16, #tpu.memory_space<vmem>>, vector<2x12x16xbf16>
    %1 = arith.extf %0 : vector<2x12x16xbf16> to vector<2x12x16xf32>
    %cst = arith.constant 0.000000e+00 : f32
    %2 = vector.broadcast %cst : f32 to vector<2x8x48xf32>
    %c0_2 = arith.constant 0 : index
    %c0_3 = arith.constant 0 : index
    %c80 = arith.constant 80 : index
    %3 = vector.load %arg5[%c0_2, %c0_3, %c80] : memref<2x8x128xf32, #tpu.memory_space<vmem>>, vector<2x8x48xf32>
    tpu.vector_store %arg5[%c0_2, %c0_3, %c80], %2 {strides = array<i32>} : memref<2x8x128xf32, #tpu.memory_space<vmem>>, vector<2x8x48xf32>,
    %4 = vector.extract_strided_slice %1 {offsets = [0, 0, 0], sizes = [2, 8, 16], strides = [1, 1, 1]} : vector<2x12x16xf32> to vector<2x8x16xf32>
    %c0_4 = arith.constant 0 : index
    %c0_5 = arith.constant 0 : index
    %c0_6 = arith.constant 0 : index
    %5 = vector.load %arg5[%c0_4, %c0_5, %c0_6] : memref<2x8x128xf32, #tpu.memory_space<vmem>>, vector<2x8x16xf32>
    tpu.vector_store %arg5[%c0_4, %c0_5, %c0_6], %4 {strides = array<i32>} : memref<2x8x128xf32, #tpu.memory_space<vmem>>, vector<2x8x16xf32>,
    %6 = vector.extract_strided_slice %1 {offsets = [0, 1, 0], sizes = [2, 8, 16], strides = [1, 1, 1]} : vector<2x12x16xf32> to vector<2x8x16xf32>
    %c0_7 = arith.constant 0 : index
    %c0_8 = arith.constant 0 : index
    %c16 = arith.constant 16 : index
    %7 = vector.load %arg5[%c0_7, %c0_8, %c16] : memref<2x8x128xf32, #tpu.memory_space<vmem>>, vector<2x8x16xf32>
    tpu.vector_store %arg5[%c0_7, %c0_8, %c16], %6 {strides = array<i32>} : memref<2x8x128xf32, #tpu.memory_space<vmem>>, vector<2x8x16xf32>,
    %8 = vector.extract_strided_slice %1 {offsets = [0, 2, 0], sizes = [2, 8, 16], strides = [1, 1, 1]} : vector<2x12x16xf32> to vector<2x8x16xf32>
    %c0_9 = arith.constant 0 : index
    %c0_10 = arith.constant 0 : index
    %c32 = arith.constant 32 : index
    %9 = vector.load %arg5[%c0_9, %c0_10, %c32] : memref<2x8x128xf32, #tpu.memory_space<vmem>>, vector<2x8x16xf32>
    tpu.vector_store %arg5[%c0_9, %c0_10, %c32], %8 {strides = array<i32>} : memref<2x8x128xf32, #tpu.memory_space<vmem>>, vector<2x8x16xf32>,
    %10 = vector.extract_strided_slice %1 {offsets = [0, 3, 0], sizes = [2, 8, 16], strides = [1, 1, 1]} : vector<2x12x16xf32> to vector<2x8x16xf32>
    %c0_11 = arith.constant 0 : index
    %c0_12 = arith.constant 0 : index
    %c48 = arith.constant 48 : index
    %11 = vector.load %arg5[%c0_11, %c0_12, %c48] : memref<2x8x128xf32, #tpu.memory_space<vmem>>, vector<2x8x16xf32>
    tpu.vector_store %arg5[%c0_11, %c0_12, %c48], %10 {strides = array<i32>} : memref<2x8x128xf32, #tpu.memory_space<vmem>>, vector<2x8x16xf32>,
    %12 = vector.extract_strided_slice %1 {offsets = [0, 4, 0], sizes = [2, 8, 16], strides = [1, 1, 1]} : vector<2x12x16xf32> to vector<2x8x16xf32>
    %c0_13 = arith.constant 0 : index
    %c0_14 = arith.constant 0 : index
    %c64 = arith.constant 64 : index
    %13 = vector.load %arg5[%c0_13, %c0_14, %c64] : memref<2x8x128xf32, #tpu.memory_space<vmem>>, vector<2x8x16xf32>
    tpu.vector_store %arg5[%c0_13, %c0_14, %c64], %12 {strides = array<i32>} : memref<2x8x128xf32, #tpu.memory_space<vmem>>, vector<2x8x16xf32>,
    %c0_15 = arith.constant 0 : index
    %c0_16 = arith.constant 0 : index
    %c0_17 = arith.constant 0 : index
    %14 = vector.load %arg5[%c0_15, %c0_16, %c0_17] : memref<2x8x128xf32, #tpu.memory_space<vmem>>, vector<2x8x128xf32>
    %15 = vector.shape_cast %14 : vector<2x8x128xf32> to vector<16x128xf32>
    %16 = arith.truncf %15 : vector<16x128xf32> to vector<16x128xbf16>
    %c0_18 = arith.constant 0 : index
    %c0_19 = arith.constant 0 : index
    %17 = vector.load %arg2[%c0_18, %c0_19] : memref<128x1024xbf16, #tpu.memory_space<vmem>>, vector<128x1024xbf16>
    %cst_20 = arith.constant dense<0.000000e+00> : vector<16x1024xf32>
    %18 = tpu.matmul %16, %17, %cst_20 {dimension_numbers = #tpu.dot_dimension_numbers<[1], [0], [0], [1], [0, 0, 1, 1], [], []>} : vector<16x128xbf16>, vector<128x1024xbf16>, vector<16x1024xf32> -> vector<16x1024xf32>
    %19 = vector.shape_cast %18 : vector<16x1024xf32> to vector<2x8x1024xf32>
    %cst_21 = arith.constant dense<0xFF800000> : vector<2x1024xf32>
    %20 = vector.multi_reduction <maximumf>, %19, %cst_21 [1] : vector<2x8x1024xf32> to vector<2x1024xf32>
    %c0_22 = arith.constant 0 : index
    %c0_23 = arith.constant 0 : index
    %21 = vector.load %arg3[%c0_22, %c0_23] : memref<1x1024xf32, #tpu.memory_space<vmem>>, vector<1x1024xf32>
    %22 = vector.broadcast %21 : vector<1x1024xf32> to vector<2x1024xf32>
    %23 = arith.addf %20, %22 : vector<2x1024xf32>
    %cst_24 = arith.constant 0.000000e+00 : f32
    %24 = vector.broadcast %cst_24 : f32 to vector<2x1024xf32>
    %25 = arith.maximumf %23, %24 : vector<2x1024xf32>
    %26 = vector.extract_strided_slice %25 {offsets = [0, 0], sizes = [2, 128], strides = [1, 1]} : vector<2x1024xf32> to vector<2x128xf32>
    %27 = vector.extract_strided_slice %25 {offsets = [0, 128], sizes = [2, 128], strides = [1, 1]} : vector<2x1024xf32> to vector<2x128xf32>
    %28 = arith.maximumf %26, %27 : vector<2x128xf32>
    %29 = vector.extract_strided_slice %25 {offsets = [0, 256], sizes = [2, 128], strides = [1, 1]} : vector<2x1024xf32> to vector<2x128xf32>
    %30 = arith.maximumf %28, %29 : vector<2x128xf32>
    %31 = vector.extract_strided_slice %25 {offsets = [0, 384], sizes = [2, 128], strides = [1, 1]} : vector<2x1024xf32> to vector<2x128xf32>
    %32 = arith.maximumf %30, %31 : vector<2x128xf32>
    %33 = vector.extract_strided_slice %25 {offsets = [0, 512], sizes = [2, 128], strides = [1, 1]} : vector<2x1024xf32> to vector<2x128xf32>
    %34 = arith.maximumf %32, %33 : vector<2x128xf32>
    %35 = vector.extract_strided_slice %25 {offsets = [0, 640], sizes = [2, 128], strides = [1, 1]} : vector<2x1024xf32> to vector<2x128xf32>
    %36 = arith.maximumf %34, %35 : vector<2x128xf32>
    %37 = vector.extract_strided_slice %25 {offsets = [0, 768], sizes = [2, 128], strides = [1, 1]} : vector<2x1024xf32> to vector<2x128xf32>
    %38 = arith.maximumf %36, %37 : vector<2x128xf32>
    %39 = vector.extract_strided_slice %25 {offsets = [0, 896], sizes = [2, 128], strides = [1, 1]} : vector<2x1024xf32> to vector<2x128xf32>
    %40 = arith.maximumf %38, %39 : vector<2x128xf32>
    %c0_25 = arith.constant 0 : index
    %c0_26 = arith.constant 0 : index
    %41 = vector.load %arg4[%c0_25, %c0_26] : memref<2x128xf32, #tpu.memory_space<vmem>>, vector<2x128xf32>
    tpu.vector_store %arg4[%c0_25, %c0_26], %40 {strides = array<i32>} : memref<2x128xf32, #tpu.memory_space<vmem>>, vector<2x128xf32>,
    return
  }
  func.func @transform_0(%arg0: i32) -> (i32, i32, i32) {
    %c0_i32 = arith.constant 0 : i32
    %c0_i32_0 = arith.constant 0 : i32
    %c0_i32_1 = arith.constant 0 : i32
    return %arg0, %c0_i32, %c0_i32_0 : i32, i32, i32
  }
  func.func @transform_1(%arg0: i32) -> (i32, i32) {
    %c0_i32 = arith.constant 0 : i32
    %c0_i32_0 = arith.constant 0 : i32
    %c0_i32_1 = arith.constant 0 : i32
    return %c0_i32, %c0_i32_0 : i32, i32
  }
  func.func @transform_2(%arg0: i32) -> (i32, i32) {
    %c0_i32 = arith.constant 0 : i32
    %c0_i32_0 = arith.constant 0 : i32
    %c0_i32_1 = arith.constant 0 : i32
    return %c0_i32, %c0_i32_0 : i32, i32
  }
  func.func @transform_3(%arg0: i32) -> (i32, i32) {
    %c0_i32 = arith.constant 0 : i32
    %c0_i32_0 = arith.constant 0 : i32
    return %arg0, %c0_i32 : i32, i32
  }
}

</mosaic_0001>

<bundles_post_ra>
// kernel: tpu_custom_call.1
= control target key start
LH: loop header
LB: loop body
LE: loop exit
PB: predicated region body
PF: predicated region fallthrough
CT: control target
= control target key end

     0   :  { %8 = vsyncpa [#allocation4], 0  ;;  %s1338_s0 = inlined_call_operand.vmem [shape: bf16[2,12,16], index: 0, kind: input, shape index: {}]   ;;  %s1339_s1 = inlined_call_operand.hbm [shape: bf16[128,1024], index: 1, kind: input, shape index: {}]   ;;  %s1340_s2 = inlined_call_operand.vmem [shape: f32[1,1024], index: 2, kind: input, shape index: {}]   ;;  %s1341_s3 = inlined_call_operand.hbm [shape: f32[2,128], index: 3, kind: output, shape index: {}]  }
   0x1   :  { %9 = vsyncpa [#allocation5], 0  ;;  %s16_s14 = sshll.u32 %s1339_s1, 4  ;;  %s1224_s15 = smov [#allocation3]   ;;  %s17_s14 = int_to_ptr.hbm [resolvable:$true] %s16_s14 }
   0x2   :  { %s18_s16 = sshll.u32 %s1224_s15, 4  ;;  %s1225_s17 = smov 512   ;;  %s19_s16 = int_to_ptr.vmem [resolvable:$true] %s18_s16 }
   0x3   :  { %s1226_s18 = smov 32  }
   0x4   :  { %24 = dma.hbm_to_vmem [thread:$0]  %s17_s14, 8192, %s19_s16, [#allocation4], %s1225_s17, %s1225_s17, %s1226_s18  }
   0x5   :  { %1220 = dma.done.wait [#allocation4], 8192  }
   0x6   :  { %1221 = vsyncadd [#allocation4], 4294959104  ;;  %v1259_v0 = vld [vmem:[%s1338_s0] sm:$0xf]  ;;  %v32_v1 = vld [vmem:[%s1338_s0 + $0x4] sm:$0x3] }
   0x7   :  { %v1267_v2 = vld [vmem:[%s1338_s0 + $0x8] sm:$0xf]  ;;  %v35_v3 = vunpack.c.l.bf16 %v1259_v0  ;;  %v36_v4 = vunpack.c.l.bf16 %v32_v1  ;;  %v34_v5 = vld [vmem:[%s1338_s0 + $0xc] sm:$0x3]  ;;  %v1030_v6 = vld [vmem:[#allocation3 + $0x1c0] sm:$0xf] }
   0x8   :  { %v1120_v7 = vld [vmem:[#allocation3 + $0x1dc] sm:$0xf0]  ;;  %v1116_v9 = vld [vmem:[#allocation3 + $0x1c4] sm:$0xf]  ;;  %v1038_v11 = vld [vmem:[#allocation3 + $0x1c8] sm:$0xf]  ;;  %v37_v16 = vunpack.c.l.bf16 %v1267_v2  ;;  %v38_v20 = vunpack.c.l.bf16 %v34_v5 }
   0x9   :  { %v1031_v8 = vor.u32 %v1120_v7, %v1030_v6  ;;  %v1032_v10 = vld [vmem:[#allocation3 + $0x1e0] sm:$0xf0]  ;;  %v1275_v12 = vpack.i.bf16 %v36_v4, %v35_v3  ;;  %v1121_v13 = vld [vmem:[#allocation3 + $0x1e4] sm:$0xf0]  ;;  %v1117_v14 = vld [vmem:[#allocation3 + $0x1cc] sm:$0xf] }
   0xa   :  { %v1040_v15 = vld [vmem:[#allocation3 + $0x1e8] sm:$0xf0]  ;;  %v998_v17 = vld [vmem:[#allocation3 + $0x180] sm:$0xf]  ;;  %v1108_v19 = vld [vmem:[#allocation3 + $0x184] sm:$0xf]  ;;  %v1035_v21 = vor.u32 %v1116_v9, %v1032_v10  ;;  %v1039_v22 = vor.u32 %v1121_v13, %v1038_v11  ;;  %v1147_v41 = vpack.i.bf16 %v38_v20, %v37_v16 }
   0xb   :  { %508 = vmatpush.bf16.msra.mxu0 %v1031_v8  ;;  %v1112_v18 = vld [vmem:[#allocation3 + $0x19c] sm:$0xf0]  ;;  %1143 = vrot.lane.b32.xlu1 %v1275_v12, %s1226_s18  ;;  %s1227_s0 = smov 16   ;;  %v1043_v23 = vor.u32 %v1117_v14, %v1040_v15  ;;  %v1000_v24 = vld [vmem:[#allocation3 + $0x1a0] sm:$0xf0]  ;;  %s1228_s26 = smov 48  }
   0xc   :  { %1133 = vrot.lane.b32.xlu0 %v1275_v12, %s1227_s0  ;;  %v1006_v25 = vld [vmem:[#allocation3 + $0x188] sm:$0xf]  ;;  %1153 = vrot.lane.b32.xlu2 %v1275_v12, %s1228_s26  ;;  %v999_v27 = vor.u32 %v1112_v18, %v998_v17  ;;  %v1109_v28 = vld [vmem:[#allocation3 + $0x18c] sm:$0xf]  ;;  %v966_v30 = vld [vmem:[#allocation3 + $0x140] sm:$0xf]  ;;  %v1003_v31 = vor.u32 %v1108_v19, %v1000_v24 }
   0xd   :  { %v1113_v26 = vld [vmem:[#allocation3 + $0x1a4] sm:$0xf0]  ;;  %v1008_v29 = vld [vmem:[#allocation3 + $0x1a8] sm:$0xf0]  ;;  %522 = vmatpush.bf16.msra.mxu1 %v1035_v21  ;;  %536 = vmatpush.bf16.msra.mxu2 %v1039_v22  ;;  %v1104_v33 = vld [vmem:[#allocation3 + $0x15c] sm:$0xf0] }
   0xe   :  { %v1007_v32 = vor.u32 %v1113_v26, %v1006_v25  ;;  %v1100_v34 = vld [vmem:[#allocation3 + $0x144] sm:$0xf]  ;;  %550 = vmatpush.bf16.msra.mxu3 %v1043_v23  ;;  %v1011_v36 = vor.u32 %v1109_v28, %v1008_v29  ;;  %v967_v37 = vor.u32 %v1104_v33, %v966_v30  ;;  %v974_v38 = vld [vmem:[#allocation3 + $0x148] sm:$0xf]  ;;  %v1101_v40 = vld [vmem:[#allocation3 + $0x14c] sm:$0xf] }
   0xf   :  { %v968_v35 = vld [vmem:[#allocation3 + $0x160] sm:$0xf0]  ;;  %509 = vmatpush.bf16.msra.mxu0 %v999_v27  ;;  %v1105_v39 = vld [vmem:[#allocation3 + $0x164] sm:$0xf0]  ;;  %v976_v42 = vld [vmem:[#allocation3 + $0x168] sm:$0xf0] }
  0x10   :  { %v934_v43 = vld [vmem:[#allocation3 + $0x100] sm:$0xf]  ;;  %v971_v45 = vor.u32 %v1100_v34, %v968_v35  ;;  %v975_v46 = vor.u32 %v1105_v39, %v974_v38  ;;  %v1092_v47 = vld [vmem:[#allocation3 + $0x104] sm:$0xf]  ;;  %v979_v48 = vor.u32 %v1101_v40, %v976_v42  ;;  %v942_v51 = vld [vmem:[#allocation3 + $0x108] sm:$0xf] }
  0x11   :  { %v1096_v44 = vld [vmem:[#allocation3 + $0x11c] sm:$0xf0]  ;;  %523 = vmatpush.bf16.msra.mxu1 %v1003_v31  ;;  %537 = vmatpush.bf16.msra.mxu2 %v1007_v32  ;;  %v936_v50 = vld [vmem:[#allocation3 + $0x120] sm:$0xf0]  ;;  %v1097_v52 = vld [vmem:[#allocation3 + $0x124] sm:$0xf0] }
  0x12   :  { %551 = vmatpush.bf16.msra.mxu3 %v1011_v36  ;;  %v935_v49 = vor.u32 %v1096_v44, %v934_v43  ;;  %v1093_v53 = vld [vmem:[#allocation3 + $0x10c] sm:$0xf]  ;;  %v939_v55 = vor.u32 %v1092_v47, %v936_v50  ;;  %v943_v56 = vor.u32 %v1097_v52, %v942_v51  ;;  %s1229_s27 = smov 64   ;;  %v902_v58 = vld [vmem:[#allocation3 + $0xc0] sm:$0xf]  ;;  %vm39_vm0 = vcmask 1048192  }
  0x13   :  { %510 = vmatpush.bf16.msra.mxu0 %v967_v37  ;;  %1148 = vrot.lane.b32.xlu1 %v1147_v41, %s1226_s18  ;;  %v944_v54 = vld [vmem:[#allocation3 + $0x128] sm:$0xf0]  ;;  %v1088_v59 = vld [vmem:[#allocation3 + $0xdc] sm:$0xf0]  ;;  %v1084_v60 = vld [vmem:[#allocation3 + $0xc4] sm:$0xf] }
  0x14   :  { %1138 = vrot.lane.b32.xlu0 %v1147_v41, %s1227_s0  ;;  %1158 = vrot.lane.b32.xlu2 %v1147_v41, %s1228_s26  ;;  %v947_v57 = vor.u32 %v1093_v53, %v944_v54  ;;  %v903_v61 = vor.u32 %v1088_v59, %v902_v58  ;;  %v904_v62 = vld [vmem:[#allocation3 + $0xe0] sm:$0xf0]  ;;  %v910_v63 = vld [vmem:[#allocation3 + $0xc8] sm:$0xf]  ;;  %v1230_v1 = vmov 0.0   ;;  %vm42_vm1 = vcmask 130048  }
  0x15   :  { %524 = vmatpush.bf16.msra.mxu1 %v971_v45  ;;  %538 = vmatpush.bf16.msra.mxu2 %v975_v46  ;;  %40 = vst.msk [vmem:[#allocation2] sm:$0xff] %vm39_vm0, %v1230_v1  ;;  %v907_v4 = vor.u32 %v1084_v60, %v904_v62  ;;  %v1089_v5 = vld [vmem:[#allocation3 + $0xe4] sm:$0xf0]  ;;  %v1085_v6 = vld [vmem:[#allocation3 + $0xcc] sm:$0xf]  ;;  %vm61_vm2 = vcmask 261249  }
  0x16   :  { %552 = vmatpush.bf16.msra.mxu3 %v979_v48  ;;  %43 = vst.msk [vmem:[#allocation2] sm:$0xff] %vm42_vm1, %v35_v3  ;;  %v911_v7 = vor.u32 %v1089_v5, %v910_v63  ;;  %v912_v8 = vld [vmem:[#allocation3 + $0xe8] sm:$0xf0]  ;;  %v870_v9 = vld [vmem:[#allocation3 + $0x80] sm:$0xf]  ;;  %vm63_vm3 = vcmask 254080  }
  0x17   :  { %511 = vmatpush.bf16.msra.mxu0 %v935_v49  ;;  %41 = vst.msk [vmem:[#allocation2 + $0x8] sm:$0xff] %vm39_vm0, %v1230_v1  ;;  %v915_v10 = vor.u32 %v1085_v6, %v912_v8  ;;  %v1080_v11 = vld [vmem:[#allocation3 + $0x9c] sm:$0xf0]  ;;  %v872_v14 = vld [vmem:[#allocation3 + $0xa0] sm:$0xf0]  ;;  %vm81_vm4 = vcmask 386304  }
  0x18   :  { %44 = vst.msk [vmem:[#allocation2 + $0x8] sm:$0xff] %vm42_vm1, %v37_v16  ;;  %v871_v13 = vor.u32 %v1080_v11, %v870_v9  ;;  %v878_v0 = vld [vmem:[#allocation3 + $0x88] sm:$0xf]  ;;  %v1077_v18 = vld [vmem:[#allocation3 + $0x8c] sm:$0xf]  ;;  %vm79_vm5 = vcmask 392450  }
  0x19   :  { %525 = vmatpush.bf16.msra.mxu1 %v939_v55  ;;  %539 = vmatpush.bf16.msra.mxu2 %v943_v56  ;;  %v1081_v3 = vld [vmem:[#allocation3 + $0xa4] sm:$0xf0]  ;;  %v880_v19 = vld [vmem:[#allocation3 + $0xa8] sm:$0xf0]  ;;  %v838_v21 = vld [vmem:[#allocation3 + $0x40] sm:$0xf] }
  0x1a   :  { %553 = vmatpush.bf16.msra.mxu3 %v947_v57  ;;  %v879_v17 = vor.u32 %v1081_v3, %v878_v0  ;;  %v883_v20 = vor.u32 %v1077_v18, %v880_v19  ;;  %v1072_v2 = vld [vmem:[#allocation3 + $0x5c] sm:$0xf0]  ;;  %v1068_v16 = vld [vmem:[#allocation3 + $0x44] sm:$0xf]  ;;  %v846_v24 = vld [vmem:[#allocation3 + $0x48] sm:$0xf] }
  0x1b   :  { %1168 = vrot.lane.b32.xlu1 %v1147_v41, %s1229_s27  ;;  %512 = vmatpush.bf16.msra.mxu0 %v903_v61  ;;  %v839_v22 = vor.u32 %v1072_v2, %v838_v21  ;;  %v840_v23 = vld [vmem:[#allocation3 + $0x60] sm:$0xf0]  ;;  %v1073_v25 = vld [vmem:[#allocation3 + $0x64] sm:$0xf0]  ;;  %v1069_v28 = vld [vmem:[#allocation3 + $0x4c] sm:$0xf] }
  0x1c   :  { %1163 = vrot.lane.b32.xlu0 %v1275_v12, %s1229_s27  ;;  %v1076_v12 = vld [vmem:[#allocation3 + $0x84] sm:$0xf]  ;;  %v843_v26 = vor.u32 %v1068_v16, %v840_v23  ;;  %v847_v27 = vor.u32 %v1073_v25, %v846_v24  ;;  %v848_v29 = vld [vmem:[#allocation3 + $0x68] sm:$0xf0]  ;;  %v806_v31 = vld [vmem:[#allocation3] sm:$0xf] }
  0x1d   :  { %526 = vmatpush.bf16.msra.mxu1 %v907_v4  ;;  %540 = vmatpush.bf16.msra.mxu2 %v911_v7  ;;  %v875_v15 = vor.u32 %v1076_v12, %v872_v14  ;;  %v851_v30 = vor.u32 %v1069_v28, %v848_v29  ;;  %v1064_v32 = vld [vmem:[#allocation3 + $0x1c] sm:$0xf0]  ;;  %v1060_v33 = vld [vmem:[#allocation3 + $0x4] sm:$0xf]  ;;  %v814_v36 = vld [vmem:[#allocation3 + $0x8] sm:$0xf] }
  0x1e   :  { %554 = vmatpush.bf16.msra.mxu3 %v915_v10  ;;  %v807_v34 = vor.u32 %v1064_v32, %v806_v31  ;;  %v808_v35 = vld [vmem:[#allocation3 + $0x20] sm:$0xf0]  ;;  %v1065_v37 = vld [vmem:[#allocation3 + $0x24] sm:$0xf0]  ;;  %v1061_v40 = vld [vmem:[#allocation3 + $0xc] sm:$0xf] }
  0x1f   :  { %513 = vmatpush.bf16.msra.mxu0 %v871_v13  ;;  %v811_v38 = vor.u32 %v1060_v33, %v808_v35  ;;  %v815_v39 = vor.u32 %v1065_v37, %v814_v36  ;;  %v816_v41 = vld [vmem:[#allocation3 + $0x28] sm:$0xf0]  ;;  %v1046_v42 = vld [vmem:[#allocation3 + $0x1d0] sm:$0xf]  ;;  %v1118_v45 = vld [vmem:[#allocation3 + $0x1d4] sm:$0xf] }
  0x20   :  { %v819_v43 = vor.u32 %v1061_v40, %v816_v41  ;;  %v1122_v44 = vld [vmem:[#allocation3 + $0x1ec] sm:$0xf0]  ;;  %v1048_v46 = vld [vmem:[#allocation3 + $0x1f0] sm:$0xf0]  ;;  %v1054_v49 = vld [vmem:[#allocation3 + $0x1d8] sm:$0xf] }
  0x21   :  { %527 = vmatpush.bf16.msra.mxu1 %v875_v15  ;;  %541 = vmatpush.bf16.msra.mxu2 %v879_v17  ;;  %v1047_v47 = vor.u32 %v1122_v44, %v1046_v42  ;;  %v1051_v48 = vor.u32 %v1118_v45, %v1048_v46  ;;  %v1123_v50 = vld [vmem:[#allocation3 + $0x1f4] sm:$0xf0]  ;;  %v1119_v51 = vld [vmem:[#allocation3 + $0x1dc] sm:$0xf]  ;;  %v1014_v55 = vld [vmem:[#allocation3 + $0x190] sm:$0xf] }
  0x22   :  { %555 = vmatpush.bf16.msra.mxu3 %v883_v20  ;;  %v1055_v52 = vor.u32 %v1123_v50, %v1054_v49  ;;  %v1056_v53 = vld [vmem:[#allocation3 + $0x1f8] sm:$0xf0]  ;;  %v1114_v56 = vld [vmem:[#allocation3 + $0x1ac] sm:$0xf0]  ;;  %v1110_v57 = vld [vmem:[#allocation3 + $0x194] sm:$0xf] }
  0x23   :  { %514 = vmatpush.bf16.msra.mxu0 %v839_v22  ;;  %v1059_v54 = vor.u32 %v1119_v51, %v1056_v53  ;;  %v1015_v58 = vor.u32 %v1114_v56, %v1014_v55  ;;  %v1016_v59 = vld [vmem:[#allocation3 + $0x1b0] sm:$0xf0]  ;;  %v1022_v60 = vld [vmem:[#allocation3 + $0x198] sm:$0xf]  ;;  %v1111_v1 = vld [vmem:[#allocation3 + $0x19c] sm:$0xf] }
  0x24   :  { %v1115_v61 = vld [vmem:[#allocation3 + $0x1b4] sm:$0xf0]  ;;  %v1019_v62 = vor.u32 %v1110_v57, %v1016_v59  ;;  %v1024_v4 = vld [vmem:[#allocation3 + $0x1b8] sm:$0xf0]  ;;  %v982_v6 = vld [vmem:[#allocation3 + $0x150] sm:$0xf] }
  0x25   :  { %528 = vmatpush.bf16.msra.mxu1 %v843_v26  ;;  %542 = vmatpush.bf16.msra.mxu2 %v847_v27  ;;  %v1023_v63 = vor.u32 %v1115_v61, %v1022_v60  ;;  %v1027_v5 = vor.u32 %v1111_v1, %v1024_v4  ;;  %v1106_v7 = vld [vmem:[#allocation3 + $0x16c] sm:$0xf0]  ;;  %v1102_v8 = vld [vmem:[#allocation3 + $0x154] sm:$0xf]  ;;  %v990_v11 = vld [vmem:[#allocation3 + $0x158] sm:$0xf] }
  0x26   :  { %556 = vmatpush.bf16.msra.mxu3 %v851_v30  ;;  %v983_v9 = vor.u32 %v1106_v7, %v982_v6  ;;  %v984_v10 = vld [vmem:[#allocation3 + $0x170] sm:$0xf0]  ;;  %v1107_v12 = vld [vmem:[#allocation3 + $0x174] sm:$0xf0]  ;;  %v1103_v0 = vld [vmem:[#allocation3 + $0x15c] sm:$0xf] }
  0x27   :  { %515 = vmatpush.bf16.msra.mxu0 %v807_v34  ;;  %v987_v13 = vor.u32 %v1102_v8, %v984_v10  ;;  %v991_v14 = vor.u32 %v1107_v12, %v990_v11  ;;  %v992_v3 = vld [vmem:[#allocation3 + $0x178] sm:$0xf0]  ;;  %v950_v15 = vld [vmem:[#allocation3 + $0x110] sm:$0xf]  ;;  %v1094_v19 = vld [vmem:[#allocation3 + $0x114] sm:$0xf] }
  0x28   :  { %v995_v17 = vor.u32 %v1103_v0, %v992_v3  ;;  %v1098_v18 = vld [vmem:[#allocation3 + $0x12c] sm:$0xf0]  ;;  %v952_v20 = vld [vmem:[#allocation3 + $0x130] sm:$0xf0]  ;;  %v958_v2 = vld [vmem:[#allocation3 + $0x118] sm:$0xf] }
  0x29   :  { %529 = vmatpush.bf16.msra.mxu1 %v811_v38  ;;  %543 = vmatpush.bf16.msra.mxu2 %v815_v39  ;;  %v951_v21 = vor.u32 %v1098_v18, %v950_v15  ;;  %v1099_v16 = vld [vmem:[#allocation3 + $0x134] sm:$0xf0]  ;;  %v1095_v22 = vld [vmem:[#allocation3 + $0x11c] sm:$0xf]  ;;  %v955_v23 = vor.u32 %v1094_v19, %v952_v20  ;;  %vm97_vm6 = vcmask 523651   ;;  %vm99_vm7 = vcmask 518528  }
  0x2a   :  { %557 = vmatpush.bf16.msra.mxu3 %v819_v43  ;;  %v959_v24 = vor.u32 %v1099_v16, %v958_v2  ;;  %v960_v25 = vld [vmem:[#allocation3 + $0x138] sm:$0xf0]  ;;  %v918_v28 = vld [vmem:[#allocation3 + $0xd0] sm:$0xf]  ;;  %v1086_v30 = vld [vmem:[#allocation3 + $0xd4] sm:$0xf] }
  0x2b   :  { %564 = vmatpush.bf16.msrb.mxu0 %v1047_v47  ;;  %v963_v26 = vor.u32 %v1095_v22, %v960_v25  ;;  %v1090_v29 = vld [vmem:[#allocation3 + $0xec] sm:$0xf0]  ;;  %v920_v34 = vld [vmem:[#allocation3 + $0xf0] sm:$0xf0]  ;;  %v926_v35 = vld [vmem:[#allocation3 + $0xd8] sm:$0xf] }
  0x2c   :  { %v919_v33 = vor.u32 %v1090_v29, %v918_v28  ;;  %v1091_v36 = vld [vmem:[#allocation3 + $0xf4] sm:$0xf0]  ;;  %v1087_v40 = vld [vmem:[#allocation3 + $0xdc] sm:$0xf]  ;;  %v886_v42 = vld [vmem:[#allocation3 + $0x90] sm:$0xf]  ;;  %v923_v44 = vor.u32 %v1086_v30, %v920_v34 }
  0x2d   :  { %578 = vmatpush.bf16.msrb.mxu1 %v1051_v48  ;;  %592 = vmatpush.bf16.msrb.mxu2 %v1055_v52  ;;  %v928_v41 = vld [vmem:[#allocation3 + $0xf8] sm:$0xf0]  ;;  %v927_v45 = vor.u32 %v1091_v36, %v926_v35  ;;  %v1082_v47 = vld [vmem:[#allocation3 + $0xac] sm:$0xf0]  ;;  %v1078_v48 = vld [vmem:[#allocation3 + $0x94] sm:$0xf] }
  0x2e   :  { %606 = vmatpush.bf16.msrb.mxu3 %v1059_v54  ;;  %v931_v46 = vor.u32 %v1087_v40, %v928_v41  ;;  %v888_v49 = vld [vmem:[#allocation3 + $0xb0] sm:$0xf0]  ;;  %v887_v51 = vor.u32 %v1082_v47, %v886_v42  ;;  %v894_v52 = vld [vmem:[#allocation3 + $0x98] sm:$0xf]  ;;  %v1079_v57 = vld [vmem:[#allocation3 + $0x9c] sm:$0xf] }
  0x2f   :  { %565 = vmatpush.bf16.msrb.mxu0 %v1015_v58  ;;  %v1083_v53 = vld [vmem:[#allocation3 + $0xb4] sm:$0xf0]  ;;  %v891_v55 = vor.u32 %v1078_v48, %v888_v49  ;;  %v896_v58 = vld [vmem:[#allocation3 + $0xb8] sm:$0xf0]  ;;  %v854_v60 = vld [vmem:[#allocation3 + $0x50] sm:$0xf] }
  0x30   :  { %v895_v56 = vor.u32 %v1083_v53, %v894_v52  ;;  %v899_v59 = vor.u32 %v1079_v57, %v896_v58  ;;  %v1074_v61 = vld [vmem:[#allocation3 + $0x6c] sm:$0xf0]  ;;  %v856_v1 = vld [vmem:[#allocation3 + $0x70] sm:$0xf0]  ;;  %v1075_v6 = vld [vmem:[#allocation3 + $0x74] sm:$0xf0] }
  0x31   :  { %579 = vmatpush.bf16.msrb.mxu1 %v1019_v62  ;;  %593 = vmatpush.bf16.msrb.mxu2 %v1023_v63  ;;  %v855_v62 = vor.u32 %v1074_v61, %v854_v60  ;;  %v1070_v63 = vld [vmem:[#allocation3 + $0x54] sm:$0xf]  ;;  %v1071_v11 = vld [vmem:[#allocation3 + $0x5c] sm:$0xf]  ;;  %v822_v3 = vld [vmem:[#allocation3 + $0x10] sm:$0xf] }
  0x32   :  { %607 = vmatpush.bf16.msrb.mxu3 %v1027_v5  ;;  %v862_v5 = vld [vmem:[#allocation3 + $0x58] sm:$0xf]  ;;  %v864_v12 = vld [vmem:[#allocation3 + $0x78] sm:$0xf0]  ;;  %v1066_v15 = vld [vmem:[#allocation3 + $0x2c] sm:$0xf0] }
  0x33   :  { %566 = vmatpush.bf16.msrb.mxu0 %v983_v9  ;;  %v859_v9 = vor.u32 %v1070_v63, %v856_v1  ;;  %v863_v10 = vor.u32 %v1075_v6, %v862_v5  ;;  %v867_v19 = vor.u32 %v1071_v11, %v864_v12  ;;  %v823_v20 = vor.u32 %v1066_v15, %v822_v3  ;;  %v830_v2 = vld [vmem:[#allocation3 + $0x18] sm:$0xf]  ;;  %v1309_v60 = vld [vmem:[%s1340_s2] sm:$0xff]  ;;  %s1231_s2 = smov [#allocation6]   ;;  %s794_s6 = sshll.u32 %s1341_s3, 4  ;;  %s795_s6 = int_to_ptr.hbm [resolvable:$true] %s794_s6 }
  0x34   :  { %v1067_v16 = vld [vmem:[#allocation3 + $0x34] sm:$0xf0]  ;;  %vm115_vm8 = vcmask 654852   ;;  %vm117_vm9 = vcmask 650752   ;;  %v719_v3 = vperm.slane %v1309_v60, 1  ;;  %s792_s30 = sshll.u32 %s1231_s2, 4  ;;  %s793_s30 = int_to_ptr.vmem [resolvable:$true] %s792_s30 }
  0x35   :  { %580 = vmatpush.bf16.msrb.mxu1 %v987_v13  ;;  %594 = vmatpush.bf16.msrb.mxu2 %v991_v14  ;;  %vm783_vm10 = vcmask 1041409  }
  0x36   :  { %608 = vmatpush.bf16.msrb.mxu3 %v995_v17  ;;  %v1062_v17 = vld [vmem:[#allocation3 + $0x14] sm:$0xf] }
  0x37   :  { %567 = vmatpush.bf16.msrb.mxu0 %v951_v21  ;;  %v824_v21 = vld [vmem:[#allocation3 + $0x30] sm:$0xf0] }
  0x39   :  { %581 = vmatpush.bf16.msrb.mxu1 %v955_v23  ;;  %595 = vmatpush.bf16.msrb.mxu2 %v959_v24  ;;  %v1063_v23 = vld [vmem:[#allocation3 + $0x1c] sm:$0xf] }
  0x3a   :  { %609 = vmatpush.bf16.msrb.mxu3 %v963_v26  ;;  %v832_v24 = vld [vmem:[#allocation3 + $0x38] sm:$0xf0]  ;;  %v827_v26 = vor.u32 %v1062_v17, %v824_v21 }
  0x3b   :  { %568 = vmatpush.bf16.msrb.mxu0 %v919_v33  ;;  %v835_v28 = vor.u32 %v1063_v23, %v832_v24 }
  0x3d   :  { %582 = vmatpush.bf16.msrb.mxu1 %v923_v44  ;;  %596 = vmatpush.bf16.msrb.mxu2 %v927_v45 }
  0x3e   :  { %610 = vmatpush.bf16.msrb.mxu3 %v931_v46 }
  0x3f   :  { %569 = vmatpush.bf16.msrb.mxu0 %v887_v51 }
  0x41   :  { %583 = vmatpush.bf16.msrb.mxu1 %v891_v55  ;;  %597 = vmatpush.bf16.msrb.mxu2 %v895_v56 }
  0x42   :  { %611 = vmatpush.bf16.msrb.mxu3 %v899_v59 }
  0x43   :  { %570 = vmatpush.bf16.msrb.mxu0 %v855_v62 }
  0x45   :  { %584 = vmatpush.bf16.msrb.mxu1 %v859_v9  ;;  %598 = vmatpush.bf16.msrb.mxu2 %v863_v10 }
  0x46   :  { %612 = vmatpush.bf16.msrb.mxu3 %v867_v19  ;;  %v720_v19 = vperm.slane %v1309_v60, 2 }
  0x47   :  { %571 = vmatpush.bf16.msrb.mxu0 %v823_v20 }
  0x49   :  { %585 = vmatpush.bf16.msrb.mxu1 %v827_v26 }
  0x4a   :  { %613 = vmatpush.bf16.msrb.mxu3 %v835_v28 }
  0x66   :  { %v1154_v27 = vpop.permute.xlu2 %1153 }
  0x67   :  { %v1155_v50 = vunpack.i.l.bf16 %v1154_v27  ;;  %v1156_v54 = vunpack.i.h.bf16 %v1154_v27  ;;  %v831_v27 = vor.u32 %v1067_v16, %v830_v2 }
  0x69   :  { %599 = vmatpush.bf16.msrb.mxu2 %v831_v27 }
  0x6e   :  { %v1159_v4 = vpop.permute.xlu2 %1158 }
  0x6f   :  { %v1160_v22 = vunpack.i.l.bf16 %v1159_v4  ;;  %v1161_v25 = vunpack.i.h.bf16 %v1159_v4  ;;  %v718_v4 = vperm.slane %v1309_v60, 0 }
  0x7d   :  { %v1144_v31 = vpop.permute.xlu1 %1143 }
  0x7e   :  { %v1134_v32 = vpop.permute.xlu0 %1133  ;;  %v1146_v37 = vunpack.i.h.bf16 %v1144_v31  ;;  %v1145_v43 = vunpack.i.l.bf16 %v1144_v31 }
  0x7f   :  { %v1136_v38 = vunpack.i.h.bf16 %v1134_v32  ;;  %v1135_v39 = vunpack.i.l.bf16 %v1134_v32 }
  0x81   :  { %62 = vst.msk [vmem:[#allocation2 - $0x1] sm:$0xfe] %vm61_vm2, %v1135_v39 }
  0x82   :  { %64 = vst.msk [vmem:[#allocation2 + $0x7] sm:$0x1] %vm63_vm3, %v1136_v38 }
  0x83   :  { %82 = vst.msk [vmem:[#allocation2 + $0x6] sm:$0x3] %vm81_vm4, %v1146_v37 }
  0x84   :  { %80 = vst.msk [vmem:[#allocation2 - $0x2] sm:$0xfc] %vm79_vm5, %v1145_v43 }
  0x85   :  { %98 = vst.msk [vmem:[#allocation2 - $0x3] sm:$0xf8] %vm97_vm6, %v1155_v50  ;;  %v1149_v7 = vpop.permute.xlu1 %1148 }
  0x86   :  { %100 = vst.msk [vmem:[#allocation2 + $0x5] sm:$0x7] %vm99_vm7, %v1156_v54  ;;  %v1139_v8 = vpop.permute.xlu0 %1138  ;;  %v1151_v13 = vunpack.i.h.bf16 %v1149_v7  ;;  %v1150_v18 = vunpack.i.l.bf16 %v1149_v7 }
  0x87   :  { %v1141_v14 = vunpack.i.h.bf16 %v1139_v8  ;;  %v1140_v0 = vunpack.i.l.bf16 %v1139_v8 }
  0x89   :  { %66 = vst.msk [vmem:[#allocation2 + $0xf] sm:$0x1] %vm63_vm3, %v1141_v14 }
  0x8a   :  { %65 = vst.msk [vmem:[#allocation2 + $0x7] sm:$0xfe] %vm61_vm2, %v1140_v0 }
  0x8b   :  { %84 = vst.msk [vmem:[#allocation2 + $0xe] sm:$0x3] %vm81_vm4, %v1151_v13 }
  0x8c   :  { %83 = vst.msk [vmem:[#allocation2 + $0x6] sm:$0xfc] %vm79_vm5, %v1150_v18 }
  0x8d   :  { %101 = vst.msk [vmem:[#allocation2 + $0x5] sm:$0xf8] %vm97_vm6, %v1160_v22  ;;  %v1169_v29 = vpop.permute.xlu1 %1168  ;;  %v721_v22 = vperm.slane %v1309_v60, 3 }
  0x8e   :  { %102 = vst.msk [vmem:[#allocation2 + $0xd] sm:$0x7] %vm99_vm7, %v1161_v25  ;;  %v1164_v30 = vpop.permute.xlu0 %1163  ;;  %v1171_v31 = vunpack.i.h.bf16 %v1169_v29  ;;  %v1170_v32 = vunpack.i.l.bf16 %v1169_v29 }
  0x8f   :  { %v1165_v33 = vunpack.i.l.bf16 %v1164_v30  ;;  %v1166_v34 = vunpack.i.h.bf16 %v1164_v30 }
  0x90   :  { %119 = vst.msk [vmem:[#allocation2 + $0x4] sm:$0xf0] %vm115_vm8, %v1170_v32 }
  0x91   :  { %120 = vst.msk [vmem:[#allocation2 + $0xc] sm:$0xf] %vm117_vm9, %v1171_v31 }
  0x92   :  { %116 = vst.msk [vmem:[#allocation2 - $0x4] sm:$0xf0] %vm115_vm8, %v1165_v33 }
  0x93   :  { %118 = vst.msk [vmem:[#allocation2 + $0x4] sm:$0xf] %vm117_vm9, %v1166_v34 }
  0x98   :  { %v122_v35 = vld [vmem:[#allocation2 + $0x8] sm:$0xff] }
  0x9a   :  { %v121_v36 = vld [vmem:[#allocation2] sm:$0xff] }
  0x9b   :  { %v123_v37 = vpack.c.bf16 %v122_v35, %v121_v36  ;;  %v722_v36 = vperm.slane %v1309_v60, 4 }
  0x9d   :  { %516 = vmatmul.bf16.vlgmr.msra.gmra.mxu0 %v123_v37  ;;  %530 = vmatmul.bf16.vlgmr.msra.gmra.mxu1 %v123_v37 }
  0x9e   :  { %544 = vmatmul.bf16.vlgmr.msra.gmra.mxu2 %v123_v37  ;;  %558 = vmatmul.bf16.vlgmr.msra.gmra.mxu3 %v123_v37 }
  0xad   :  { %572 = vmatmul.bf16.vlgmr.msrb.gmra.mxu0 %v123_v37  ;;  %586 = vmatmul.bf16.vlgmr.msrb.gmra.mxu1 %v123_v37 }
  0xae   :  { %600 = vmatmul.bf16.vlgmr.msrb.gmra.mxu2 %v123_v37  ;;  %614 = vmatmul.bf16.vlgmr.msrb.gmra.mxu3 %v123_v37 }
 0x11a   :  { %v517_v38 = vpop.f32.mrf.mxu0  ;;  %v531_v39 = vpop.f32.mrf.mxu1 }
 0x11b   :  { %v620_v40 = vrot.slane %v517_v38, 4  ;;  %v626_v41 = vrot.slane %v531_v39, 4 }
 0x11d   :  { %v621_v42 = vmax.f32 %v517_v38, %v620_v40  ;;  %v627_v43 = vmax.f32 %v531_v39, %v626_v41  ;;  %v723_v39 = vperm.slane %v1309_v60, 5  ;;  %v724_v41 = vperm.slane %v1309_v60, 6 }
 0x11f   :  { %v622_v44 = vrot.slane %v621_v42, 2  ;;  %v628_v45 = vrot.slane %v627_v43, 2 }
 0x121   :  { %v545_v46 = vpop.f32.mrf.mxu2  ;;  %v559_v47 = vpop.f32.mrf.mxu3  ;;  %v623_v48 = vmax.f32 %v621_v42, %v622_v44  ;;  %v629_v56 = vmax.f32 %v627_v43, %v628_v45 }
 0x122   :  { %v632_v49 = vrot.slane %v545_v46, 4  ;;  %v519_v50 = vpop.f32.mrf.mxu0  ;;  %v533_v51 = vpop.f32.mrf.mxu1  ;;  %v638_v52 = vrot.slane %v559_v47, 4 }
 0x123   :  { %v668_v53 = vrot.slane %v519_v50, 4  ;;  %v674_v54 = vrot.slane %v533_v51, 4  ;;  %v624_v59 = vrot.slane %v623_v48, 1  ;;  %v630_v5 = vrot.slane %v629_v56, 1 }
 0x124   :  { %v633_v55 = vmax.f32 %v545_v46, %v632_v49  ;;  %v639_v62 = vmax.f32 %v559_v47, %v638_v52 }
 0x125   :  { %v669_v57 = vmax.f32 %v519_v50, %v668_v53  ;;  %v675_v58 = vmax.f32 %v533_v51, %v674_v54  ;;  %v625_v10 = vmax.f32 %v623_v48, %v624_v59  ;;  %v631_v16 = vmax.f32 %v629_v56, %v630_v5 }
 0x126   :  { %v634_v61 = vrot.slane %v633_v55, 2  ;;  %v640_v15 = vrot.slane %v639_v62, 2 }
 0x127   :  { %v670_v63 = vrot.slane %v669_v57, 2  ;;  %v676_v1 = vrot.slane %v675_v58, 2  ;;  %v734_v25 = vadd.f32 %v718_v4, %v625_v10  ;;  %v735_v37 = vadd.f32 %v719_v3, %v631_v16 }
 0x128   :  { %v635_v11 = vmax.f32 %v633_v55, %v634_v61  ;;  %v641_v29 = vmax.f32 %v639_v62, %v640_v15 }
 0x129   :  { %v671_v6 = vmax.f32 %v669_v57, %v670_v63  ;;  %v677_v7 = vmax.f32 %v675_v58, %v676_v1  ;;  %v547_v8 = vpop.f32.mrf.mxu2  ;;  %v561_v9 = vpop.f32.mrf.mxu3  ;;  %v750_v48 = vmax.f32 %v734_v25, 0.0  ;;  %v751_v57 = vmax.f32 %v735_v37, 0.0 }
 0x12a   :  { %v680_v12 = vrot.slane %v547_v8, 4  ;;  %v686_v13 = vrot.slane %v561_v9, 4  ;;  %v573_v14 = vpop.f32.mrf.mxu0  ;;  %v587_v0 = vpop.f32.mrf.mxu1  ;;  %v636_v26 = vrot.slane %v635_v11, 1  ;;  %v642_v49 = vrot.slane %v641_v29, 1 }
 0x12b   :  { %v672_v17 = vrot.slane %v671_v6, 1  ;;  %v644_v18 = vrot.slane %v573_v14, 4  ;;  %v678_v20 = vrot.slane %v677_v7, 1  ;;  %v650_v24 = vrot.slane %v587_v0, 4 }
 0x12c   :  { %v681_v21 = vmax.f32 %v547_v8, %v680_v12  ;;  %v687_v2 = vmax.f32 %v561_v9, %v686_v13  ;;  %v637_v43 = vmax.f32 %v635_v11, %v636_v26  ;;  %v766_v13 = vmax.f32 %v750_v48, %v751_v57 }
 0x12d   :  { %v645_v23 = vmax.f32 %v573_v14, %v644_v18  ;;  %v673_v30 = vmax.f32 %v671_v6, %v672_v17  ;;  %v651_v32 = vmax.f32 %v587_v0, %v650_v24  ;;  %v679_v33 = vmax.f32 %v677_v7, %v678_v20 }
 0x12e   :  { %v682_v27 = vrot.slane %v681_v21, 2  ;;  %v688_v28 = vrot.slane %v687_v2, 2  ;;  %v736_v62 = vadd.f32 %v720_v19, %v637_v43  ;;  %v643_v6 = vmax.f32 %v641_v29, %v642_v49 }
 0x12f   :  { %v646_v31 = vrot.slane %v645_v23, 2  ;;  %v652_v45 = vrot.slane %v651_v32, 2  ;;  %v742_v50 = vadd.f32 %v718_v4, %v673_v30  ;;  %v743_v53 = vadd.f32 %v719_v3, %v679_v33 }
 0x130   :  { %v683_v34 = vmax.f32 %v681_v21, %v682_v27  ;;  %v689_v35 = vmax.f32 %v687_v2, %v688_v28  ;;  %v752_v17 = vmax.f32 %v736_v62, 0.0  ;;  %v737_v16 = vadd.f32 %v721_v22, %v643_v6 }
 0x131   :  { %v647_v38 = vmax.f32 %v645_v23, %v646_v31  ;;  %v601_v40 = vpop.f32.mrf.mxu2  ;;  %v615_v42 = vpop.f32.mrf.mxu3  ;;  %v653_v63 = vmax.f32 %v651_v32, %v652_v45  ;;  %v758_v7 = vmax.f32 %v742_v50, 0.0  ;;  %v759_v10 = vmax.f32 %v743_v53, 0.0 }
 0x132   :  { %v684_v44 = vrot.slane %v683_v34, 1  ;;  %v656_v46 = vrot.slane %v601_v40, 4  ;;  %v575_v47 = vpop.f32.mrf.mxu0  ;;  %v662_v51 = vrot.slane %v615_v42, 4  ;;  %v589_v52 = vpop.f32.mrf.mxu1  ;;  %v690_v55 = vrot.slane %v689_v35, 1 }
 0x133   :  { %v648_v58 = vrot.slane %v647_v38, 1  ;;  %v692_v61 = vrot.slane %v575_v47, 4  ;;  %v698_v5 = vrot.slane %v589_v52, 4  ;;  %v654_v18 = vrot.slane %v653_v63, 1 }
 0x134   :  { %v685_v54 = vmax.f32 %v683_v34, %v684_v44  ;;  %v657_v56 = vmax.f32 %v601_v40, %v656_v46  ;;  %v663_v59 = vmax.f32 %v615_v42, %v662_v51  ;;  %v691_v4 = vmax.f32 %v689_v35, %v690_v55 }
 0x135   :  { %v693_v9 = vmax.f32 %v575_v47, %v692_v61  ;;  %v699_v12 = vmax.f32 %v589_v52, %v698_v5  ;;  %v649_v14 = vmax.f32 %v647_v38, %v648_v58  ;;  %v767_v25 = vmax.f32 %v758_v7, %v759_v10 }
 0x136   :  { %v658_v1 = vrot.slane %v657_v56, 2  ;;  %v744_v8 = vadd.f32 %v720_v19, %v685_v54  ;;  %v664_v0 = vrot.slane %v663_v59, 2  ;;  %v745_v26 = vadd.f32 %v721_v22, %v691_v4 }
 0x137   :  { %v694_v3 = vrot.slane %v693_v9, 2  ;;  %v700_v20 = vrot.slane %v699_v12, 2  ;;  %v738_v29 = vadd.f32 %v722_v36, %v649_v14  ;;  %v768_v33 = vmax.f32 %v766_v13, %v752_v17 }
 0x138   :  { %v659_v11 = vmax.f32 %v657_v56, %v658_v1  ;;  %v760_v23 = vmax.f32 %v744_v8, 0.0  ;;  %v665_v30 = vmax.f32 %v663_v59, %v664_v0  ;;  %v655_v34 = vmax.f32 %v653_v63, %v654_v18 }
 0x139   :  { %v603_v15 = vpop.f32.mrf.mxu2  ;;  %v617_v2 = vpop.f32.mrf.mxu3  ;;  %v695_v24 = vmax.f32 %v693_v9, %v694_v3  ;;  %v701_v27 = vmax.f32 %v699_v12, %v700_v20  ;;  %v753_v44 = vmax.f32 %v737_v16, 0.0  ;;  %v761_v45 = vmax.f32 %v745_v26, 0.0 }
 0x13a   :  { %v704_v21 = vrot.slane %v603_v15, 4  ;;  %v660_v19 = vrot.slane %v659_v11, 1  ;;  %v710_v32 = vrot.slane %v617_v2, 4  ;;  %v769_v38 = vmax.f32 %v767_v25, %v760_v23 }
 0x13b   :  { %v696_v31 = vrot.slane %v695_v24, 1  ;;  %v702_v35 = vrot.slane %v701_v27, 1  ;;  %v754_v47 = vmax.f32 %v738_v29, 0.0  ;;  %v666_v48 = vrot.slane %v665_v30, 1 }
 0x13c   :  { %v705_v28 = vmax.f32 %v603_v15, %v704_v21  ;;  %v661_v40 = vmax.f32 %v659_v11, %v660_v19  ;;  %v711_v43 = vmax.f32 %v617_v2, %v710_v32  ;;  %v770_v51 = vmax.f32 %v768_v33, %v753_v44 }
 0x13d   :  { %v697_v42 = vmax.f32 %v695_v24, %v696_v31  ;;  %v703_v46 = vmax.f32 %v701_v27, %v702_v35  ;;  %v739_v52 = vadd.f32 %v723_v39, %v655_v34  ;;  %v771_v55 = vmax.f32 %v769_v38, %v761_v45 }
 0x13e   :  { %v706_v37 = vrot.slane %v705_v28, 2  ;;  %v712_v50 = vrot.slane %v711_v43, 2  ;;  %v740_v56 = vadd.f32 %v724_v41, %v661_v40  ;;  %v725_v59 = vperm.slane %v1309_v60, 7 }
 0x13f   :  { %v746_v49 = vadd.f32 %v722_v36, %v697_v42  ;;  %v747_v53 = vadd.f32 %v723_v39, %v703_v46  ;;  %v772_v62 = vmax.f32 %v770_v51, %v754_v47  ;;  %v667_v36 = vmax.f32 %v665_v30, %v666_v48 }
 0x140   :  { %v707_v22 = vmax.f32 %v705_v28, %v706_v37  ;;  %v713_v58 = vmax.f32 %v711_v43, %v712_v50  ;;  %v755_v7 = vmax.f32 %v739_v52, 0.0  ;;  %v756_v39 = vmax.f32 %v740_v56, 0.0 }
 0x141   :  { %v762_v57 = vmax.f32 %v746_v49, 0.0  ;;  %v763_v5 = vmax.f32 %v747_v53, 0.0  ;;  %v741_v11 = vadd.f32 %v725_v59, %v667_v36 }
 0x142   :  { %v708_v54 = vrot.slane %v707_v22, 1  ;;  %v714_v1 = vrot.slane %v713_v58, 1  ;;  %v774_v4 = vmax.f32 %v772_v62, %v755_v7 }
 0x143   :  { %v773_v63 = vmax.f32 %v771_v55, %v762_v57  ;;  %v757_v3 = vmax.f32 %v741_v11, 0.0 }
 0x144   :  { %v709_v61 = vmax.f32 %v707_v22, %v708_v54  ;;  %v715_v8 = vmax.f32 %v713_v58, %v714_v1  ;;  %v776_v14 = vmax.f32 %v774_v4, %v756_v39 }
 0x145   :  { %v775_v9 = vmax.f32 %v773_v63, %v763_v5 }
 0x146   :  { %v748_v6 = vadd.f32 %v724_v41, %v709_v61  ;;  %v749_v12 = vadd.f32 %v725_v59, %v715_v8  ;;  %v778_v60 = vmax.f32 %v776_v14, %v757_v3 }
 0x148   :  { %v764_v10 = vmax.f32 %v748_v6, 0.0  ;;  %v765_v0 = vmax.f32 %v749_v12, 0.0 }
 0x14a   :  { %v777_v13 = vmax.f32 %v775_v9, %v764_v10 }
 0x14c   :  { %v779_v15 = vmax.f32 %v777_v13, %v765_v0 }
 0x14e   :  { %v782_v41 = vrot.slane %v779_v15, 7 }
 0x150   :  { %v784_v17 = vsel %vm783_vm10, %v782_v41, %v778_v60 }
 0x151   :  { %786 = vst [vmem:[#allocation6] sm:$0x3] %v784_v17 }
 0x152   :  { %797 = dma.vmem_to_hbm [thread:$0]  %s793_s30, 32, %s795_s6, [#allocation5]  }
 0x153   :  { %1222 = dma.done.wait [#allocation5], 32  }
 0x154   :  { %1223 = vsyncadd [#allocation5], 4294967264 }
 0x155   :  { %802 = vsyncpa [#allocation4], 1 }
 0x156   :  { %803 = vsyncpa [#allocation5], 1 }

</bundles_post_ra>
